<compile_context>
chip_gen: v5e
topology: v5e:2x2
jax: 0.10.0
libtpu: 0.0.40
codegen_flags: <defaults>
</compile_context>

<pallas_src>
import functools

import jax
import jax.numpy as jnp
from jax.experimental import pallas as pl
from jax.experimental.pallas import tpu as pltpu

_LANE = 128
_MIB = 1024 * 1024
_SMALL_HW_PAD_THRESHOLD = 256   # pad the lane axis only below this size


# --------------------------------------------------------------------------- #
# Generation-aware VMEM budgets / core count
# --------------------------------------------------------------------------- #
def _tpu_vmem_and_cores():
    """(physical VMEM bytes per TensorCore, TensorCores sharing a 'parallel' axis)."""
    kind = ""
    try:
        kind = jax.devices()[0].device_kind.lower()
    except Exception:
        kind = ""
    vmem = None
    try:
        vmem = int(pltpu.get_tpu_info().vmem_capacity_bytes)
    except Exception:
        vmem = None
    if vmem is None:
        # Conservative default when the query is unavailable.
        vmem = 64 * _MIB if ("v7" in kind or not kind) else 128 * _MIB
    num_cores = 2 if "v7" in kind else 1
    return vmem, num_cores


def _vmem_budgets():
    vmem_cap, num_cores = _tpu_vmem_and_cores()
    if vmem_cap >= 128 * _MIB:                     # v5e / v6e (128 MiB VMEM)
        return 112 * _MIB, 96 * _MIB, num_cores
    return 48 * _MIB, 40 * _MIB, num_cores         # v7x (64 MiB per TC) / unknown


def _choose_block_batch(B, per_sample_bytes, budget, num_cores):
    """Largest bt dividing B whose double-buffered in+out blocks fit the budget.
    On multi-core parts prefer a bt whose grid length is a multiple of the core
    count (balanced megacore sharding); single-core parts take the max block."""
    max_bt = max(1, int(budget // (4 * per_sample_bytes)))   # 2x in + 2x out buffers
    divisors = [d for d in range(1, B + 1) if B % d == 0 and d <= max_bt]
    if num_cores > 1 and B > 1:
        balanced = [d for d in divisors if (B // d) % num_cores == 0]
        if balanced:
            return max(balanced)
    return max(divisors)


# --------------------------------------------------------------------------- #
# Fused single-pass kernel (main path)
# --------------------------------------------------------------------------- #
def _fused_se_kernel(inv_hw, x_ref, w1_ref, w2_ref, o_ref):
    # x_ref: (bt, C, HW)   w1_ref: (C, hidden)   w2_ref: (hidden, C)   o_ref: (bt, C, HW)
    # Squeeze: f32-accumulated global mean over the spatial (lane) axis.
    y = jnp.sum(x_ref[...], axis=-1, dtype=jnp.float32) * inv_hw               # (bt, C)
    # Excitation: Linear -> ReLU -> Linear -> Sigmoid (f32 accumulation).
    h = jnp.maximum(jnp.dot(y, w1_ref[...], preferred_element_type=jnp.float32), 0.0)
    s = jnp.dot(h, w2_ref[...], preferred_element_type=jnp.float32)            # (bt, C)
    gate = jax.nn.sigmoid(s).astype(o_ref.dtype)[:, :, None]                   # (bt, C, 1)
    # Scale: second, independent read of x (keeps vreg pressure low; streams).
    o_ref[...] = (x_ref[...] * gate).astype(o_ref.dtype)


# --------------------------------------------------------------------------- #
# Two-pass fallback kernels (single sample too big for one VMEM block)
# --------------------------------------------------------------------------- #
def _mean_stripe_kernel(inv_hw, x_ref, y_ref):
    # x_ref: (1, ct, HW)   y_ref: (1, 1, ct)
    y_ref[...] = (jnp.sum(x_ref[...], axis=-1, dtype=jnp.float32) * inv_hw)[:, None, :]


def _excite_kernel(y_ref, w1_ref, w2_ref, g_ref):
    # Whole (tiny) arrays in VMEM: y (B, C) f32 -> gates (B, C) in x's dtype.
    h = jnp.maximum(jnp.dot(y_ref[...], w1_ref[...],
                            preferred_element_type=jnp.float32), 0.0)
    s = jnp.dot(h, w2_ref[...], preferred_element_type=jnp.float32)
    g_ref[...] = jax.nn.sigmoid(s).astype(g_ref.dtype)


def _scale_kernel(x_ref, g_ref, o_ref):
    # x_ref/o_ref: (1, ct, hw_tile)   g_ref: (1, ct, 1)
    o_ref[...] = (x_ref[...] * g_ref[...]).astype(o_ref.dtype)


def _se_two_pass(x_flat, w1, w2, vmem_limit, budget):
    B, C, HW = x_flat.shape
    hidden = w1.shape[1]
    itemsize = jnp.dtype(x_flat.dtype).itemsize

    # Channel stripe: largest divisor of C whose (ct, HW) stripe double-buffers
    # within the budget (means kernel streams input only; outputs are tiny).
    max_ct = max(1, int(budget // (2 * HW * itemsize)))
    ct = max(d for d in range(1, C + 1) if C % d == 0 and d <= max_ct)
    # TODO(synk): if even a single-channel stripe exceeds the budget (HW > ~5M f32
    # elements on v7x) the means pass would additionally need HW chunking.
    nct = C // ct
    N = B * nct
    x_view = x_flat.reshape(N, ct, HW)               # contiguity-preserving view

    # Pass 1: per-channel means, one channel stripe per grid step.
    y3 = pl.pallas_call(
        functools.partial(_mean_stripe_kernel, 1.0 / HW),
        out_shape=jax.ShapeDtypeStruct((N, 1, ct), jnp.float32),
        grid_spec=pltpu.PrefetchScalarGridSpec(
            num_scalar_prefetch=0,
            grid=(N,),
            in_specs=[pl.BlockSpec((1, ct, HW), lambda n: (n, 0, 0))],
            out_specs=pl.BlockSpec((1, 1, ct), lambda n: (n, 0, 0)),
        ),
        compiler_params=pltpu.CompilerParams(
            dimension_semantics=("parallel",), vmem_limit_bytes=vmem_limit),
    )(x_view)
    y = y3.reshape(B, C)

    # Pass 2: tiny excitation (whole arrays in VMEM, no grid).
    gates = pl.pallas_call(
        _excite_kernel,
        out_shape=jax.ShapeDtypeStruct((B, C), x_flat.dtype),
    )(y, w1, w2)
    gates_view = gates.reshape(N, ct, 1)

    # Pass 3: freely tiled broadcast multiply.
    if 4 * ct * HW * itemsize <= budget:
        hw_tile = HW
    else:
        max_lanes = int(budget // (4 * ct * itemsize))
        hw_tile = min(HW, max(_LANE, (max_lanes // _LANE) * _LANE))
    grid = (N, pl.cdiv(HW, hw_tile))
    out_view = pl.pallas_call(
        _scale_kernel,
        out_shape=jax.ShapeDtypeStruct((N, ct, HW), x_flat.dtype),
        grid_spec=pltpu.PrefetchScalarGridSpec(
            num_scalar_prefetch=0,
            grid=grid,
            in_specs=[
                pl.BlockSpec((1, ct, hw_tile), lambda n, s: (n, 0, s)),
                pl.BlockSpec((1, ct, 1), lambda n, s: (n, 0, 0)),
            ],
            out_specs=pl.BlockSpec((1, ct, hw_tile), lambda n, s: (n, 0, s)),
        ),
        compiler_params=pltpu.CompilerParams(
            dimension_semantics=("parallel", "parallel"),
            vmem_limit_bytes=vmem_limit),
    )(x_view, gates_view)
    return out_view.reshape(B, C, HW)


# --------------------------------------------------------------------------- #
# Public wrapper
# --------------------------------------------------------------------------- #
def se_block(x, w1, w2, *, force_two_pass=False):
    """x: (B, C, H, W) NCHW.  w1: (C, C//r).  w2: (C//r, C).  Returns (B, C, H, W)."""
    B, C, H, W = x.shape
    HW = H * W
    hidden = w1.shape[1]
    assert w1.shape == (C, hidden) and w2.shape == (hidden, C)

    vmem_limit, budget, num_cores = _vmem_budgets()
    itemsize = jnp.dtype(x.dtype).itemsize
    x_flat = x.reshape(B, C, HW)

    # Fallback when even a single sample's (C, HW) block (double-buffered in+out)
    # does not fit the VMEM budget (large feature maps, mainly a v7x cliff).
    if force_two_pass or 4 * C * HW * itemsize > budget:
        out_flat = _se_two_pass(x_flat, w1, w2, vmem_limit, budget)
        return out_flat.reshape(B, C, H, W)

    # Pad the lane axis only when HW is tiny (lane-dense stores beat the extra
    # wrapper-side HBM round trip there).  Otherwise pass HW unpadded — the
    # (8,128) rule is waived because the block dims equal the full array dims.
    pad = (HW % _LANE != 0) and (HW < _SMALL_HW_PAD_THRESHOLD)
    if pad:
        HWp = ((HW + _LANE - 1) // _LANE) * _LANE
        x_flat = jnp.pad(x_flat, ((0, 0), (0, 0), (0, HWp - HW)))
    else:
        HWp = HW

    per_sample = C * HWp * itemsize
    bt = _choose_block_batch(B, per_sample, budget, num_cores)
    grid = (B // bt,)

    out_flat = pl.pallas_call(
        functools.partial(_fused_se_kernel, 1.0 / HW),
        out_shape=jax.ShapeDtypeStruct((B, C, HWp), x.dtype),
        grid_spec=pltpu.PrefetchScalarGridSpec(
            num_scalar_prefetch=0,
            grid=grid,
            in_specs=[
                pl.BlockSpec((bt, C, HWp), lambda b: (b, 0, 0)),
                pl.BlockSpec((C, hidden), lambda b: (0, 0)),
                pl.BlockSpec((hidden, C), lambda b: (0, 0)),
            ],
            out_specs=pl.BlockSpec((bt, C, HWp), lambda b: (b, 0, 0)),
        ),
        compiler_params=pltpu.CompilerParams(
            dimension_semantics=("parallel",),
            vmem_limit_bytes=vmem_limit,
        ),
    )(x_flat, w1, w2)

    if pad:
        out_flat = out_flat[:, :, :HW]
    return out_flat.reshape(B, C, H, W)


def se_block_ref(x, w1, w2):
    """Pure-JAX reference mirroring the PyTorch forward (for correctness check)."""
    y = jnp.mean(x, axis=(2, 3))                       # (B, C)
    h = jnp.maximum(y @ w1, 0.0)                       # (B, C//r)
    s = jax.nn.sigmoid(h @ w2)                         # (B, C)
    return x * s[:, :, None, None]


if __name__ == "__main__":
    key = jax.random.PRNGKey(0)
    reduction = 16

    def make_case(k, B, C, H, W):
        kx, k1, k2 = jax.random.split(k, 3)
        hidden = max(1, C // reduction)
        x = jax.random.normal(kx, (B, C, H, W), dtype=jnp.float32)
        # nn.Linear(bias=False) weights, stored pre-transposed.
        w1 = jax.random.normal(k1, (C, hidden), dtype=jnp.float32) * 0.1
        w2 = jax.random.normal(k2, (hidden, C), dtype=jnp.float32) * 0.1
        return x, w1, w2

    cases = [
        # (shape, force_two_pass)
        ((2, 32, 16, 16), False),   # fused path, HW = 256 (lane-aligned)
        ((2, 32, 20, 20), False),   # fused path, HW = 400 unpadded (masked edge stores)
        ((2, 32, 14, 14), False),   # fused path, tiny HW = 196 -> padded lane-dense path
        ((2, 32, 16, 16), True),    # forced two-pass fallback (large-feature-map path)
    ]
    keys = jax.random.split(key, len(cases))
    for k, ((B, C, H, W), force) in zip(keys, cases):
        x, w1, w2 = make_case(k, B, C, H, W)
        out = jax.block_until_ready(se_block(x, w1, w2, force_two_pass=force))
        ref = se_block_ref(x, w1, w2)
        assert out.shape == (B, C, H, W)
        assert jnp.allclose(out, ref, atol=1e-5, rtol=1e-5), (
            f"mismatch vs reference for shape {(B, C, H, W)}, two_pass={force}")

    print("KERNEL_OK")
</pallas_src>

<mosaic_0001>
module attributes {stable_mosaic.version = 11 : i64} {
  func.func @_fused_se_kernel(%arg0: i32, %arg1: memref<2x32x256xf32, #tpu.memory_space<vmem>>, %arg2: memref<32x2xf32, #tpu.memory_space<vmem>>, %arg3: memref<2x32xf32, #tpu.memory_space<vmem>>, %arg4: memref<2x32x256xf32, #tpu.memory_space<vmem>>) attributes {dimension_semantics = [#tpu.dimension_semantics<parallel>], iteration_bounds = array<i64: 1>, scalar_prefetch = 0 : i64, scratch_operands = 0 : i64, tpu.core_type = #tpu.core_type<tc>, window_params = [{transform_indices = @transform_0, window_bounds = array<i64: 2, 32, 256>}, {pipeline_mode = #tpu.pipeline_mode<synchronous>, transform_indices = @transform_1, window_bounds = array<i64: 32, 2>}, {pipeline_mode = #tpu.pipeline_mode<synchronous>, transform_indices = @transform_2, window_bounds = array<i64: 2, 32>}, {transform_indices = @transform_3, window_bounds = array<i64: 2, 32, 256>}]} {
    %c0 = arith.constant 0 : index
    %c0_0 = arith.constant 0 : index
    %c0_1 = arith.constant 0 : index
    %0 = vector.load %arg1[%c0, %c0_0, %c0_1] : memref<2x32x256xf32, #tpu.memory_space<vmem>>, vector<2x32x256xf32>
    %cst = arith.constant dense<0.000000e+00> : vector<2x32xf32>
    %1 = vector.multi_reduction <add>, %0, %cst [2] : vector<2x32x256xf32> to vector<2x32xf32>
    %cst_2 = arith.constant 3.906250e-03 : f32
    %2 = vector.broadcast %cst_2 : f32 to vector<2x32xf32>
    %3 = arith.mulf %1, %2 : vector<2x32xf32>
    %c0_3 = arith.constant 0 : index
    %c0_4 = arith.constant 0 : index
    %4 = vector.load %arg2[%c0_3, %c0_4] : memref<32x2xf32, #tpu.memory_space<vmem>>, vector<32x2xf32>
    %cst_5 = arith.constant dense<0.000000e+00> : vector<2x2xf32>
    %5 = tpu.matmul %3, %4, %cst_5 {dimension_numbers = #tpu.dot_dimension_numbers<[1], [0], [0], [1], [0, 0, 1, 1], [], []>} : vector<2x32xf32>, vector<32x2xf32>, vector<2x2xf32> -> vector<2x2xf32>
    %cst_6 = arith.constant 0.000000e+00 : f32
    %6 = vector.broadcast %cst_6 : f32 to vector<2x2xf32>
    %7 = arith.maximumf %5, %6 : vector<2x2xf32>
    %c0_7 = arith.constant 0 : index
    %c0_8 = arith.constant 0 : index
    %8 = vector.load %arg3[%c0_7, %c0_8] : memref<2x32xf32, #tpu.memory_space<vmem>>, vector<2x32xf32>
    %cst_9 = arith.constant dense<0.000000e+00> : vector<2x32xf32>
    %9 = tpu.matmul %7, %8, %cst_9 {dimension_numbers = #tpu.dot_dimension_numbers<[1], [0], [0], [1], [0, 0, 1, 1], [], []>} : vector<2x2xf32>, vector<2x32xf32>, vector<2x32xf32> -> vector<2x32xf32>
    %10 = arith.negf %9 : vector<2x32xf32>
    %11 = math.exp %10 : vector<2x32xf32>
    %cst_10 = arith.constant 1.000000e+00 : f32
    %12 = vector.broadcast %cst_10 : f32 to vector<2x32xf32>
    %13 = arith.addf %12, %11 : vector<2x32xf32>
    %14 = arith.divf %12, %13 : vector<2x32xf32>
    %15 = vector.shape_cast %14 : vector<2x32xf32> to vector<2x32x1xf32>
    %c0_11 = arith.constant 0 : index
    %c0_12 = arith.constant 0 : index
    %c0_13 = arith.constant 0 : index
    %16 = vector.load %arg1[%c0_11, %c0_12, %c0_13] : memref<2x32x256xf32, #tpu.memory_space<vmem>>, vector<2x32x256xf32>
    %17 = vector.broadcast %15 : vector<2x32x1xf32> to vector<2x32x256xf32>
    %18 = arith.mulf %16, %17 : vector<2x32x256xf32>
    %c0_14 = arith.constant 0 : index
    %c0_15 = arith.constant 0 : index
    %c0_16 = arith.constant 0 : index
    %19 = vector.load %arg4[%c0_14, %c0_15, %c0_16] : memref<2x32x256xf32, #tpu.memory_space<vmem>>, vector<2x32x256xf32>
    tpu.vector_store %arg4[%c0_14, %c0_15, %c0_16], %18 {strides = array<i32>} : memref<2x32x256xf32, #tpu.memory_space<vmem>>, vector<2x32x256xf32>,
    return
  }
  func.func @transform_0(%arg0: i32) -> (i32, i32, i32) {
    %c0_i32 = arith.constant 0 : i32
    %c0_i32_0 = arith.constant 0 : i32
    %c0_i32_1 = arith.constant 0 : i32
    return %arg0, %c0_i32, %c0_i32_0 : i32, i32, i32
  }
  func.func @transform_1(%arg0: i32) -> (i32, i32) {
    %c0_i32 = arith.constant 0 : i32
    %c0_i32_0 = arith.constant 0 : i32
    %c0_i32_1 = arith.constant 0 : i32
    return %c0_i32, %c0_i32_0 : i32, i32
  }
  func.func @transform_2(%arg0: i32) -> (i32, i32) {
    %c0_i32 = arith.constant 0 : i32
    %c0_i32_0 = arith.constant 0 : i32
    %c0_i32_1 = arith.constant 0 : i32
    return %c0_i32, %c0_i32_0 : i32, i32
  }
  func.func @transform_3(%arg0: i32) -> (i32, i32, i32) {
    %c0_i32 = arith.constant 0 : i32
    %c0_i32_0 = arith.constant 0 : i32
    %c0_i32_1 = arith.constant 0 : i32
    return %arg0, %c0_i32, %c0_i32_0 : i32, i32, i32
  }
}

</mosaic_0001>

<bundles_post_ra>
// kernel: tpu_custom_call.1
= control target key start
LH: loop header
LB: loop body
LE: loop exit
PB: predicated region body
PF: predicated region fallthrough
CT: control target
= control target key end

     0   :  { %8 = vsyncpa [#allocation3], 0  ;;  %s476_s0 = inlined_call_operand.hbm [shape: f32[2,32,256], index: 0, kind: input, shape index: {}]   ;;  %s477_s1 = inlined_call_operand.vmem [shape: f32[32,2], index: 1, kind: input, shape index: {}]   ;;  %s478_s2 = inlined_call_operand.vmem [shape: f32[2,32], index: 2, kind: input, shape index: {}]   ;;  %s479_s3 = inlined_call_operand.hbm [shape: f32[2,32,256], index: 3, kind: output, shape index: {}]  }
   0x1   :  { %9 = vsyncpa [#allocation4], 0  ;;  %s14_s14 = sshll.u32 %s476_s0, 4  ;;  %s361_s15 = smov [#allocation2]   ;;  %s15_s14 = int_to_ptr.hbm [resolvable:$true] %s14_s14 }
   0x2   :  { %s16_s16 = sshll.u32 %s361_s15, 4  ;;  %s362_s17 = smov 256   ;;  %s17_s16 = int_to_ptr.vmem [resolvable:$true] %s16_s16 }
   0x3   :  { %s363_s18 = smov 16  }
   0x4   :  { %22 = dma.hbm_to_vmem [thread:$0]  %s15_s14, 2048, %s17_s16, [#allocation3], %s362_s17, %s362_s17, %s363_s18  }
   0x5   :  { %357 = dma.done.wait [#allocation3], 2048  }
   0x6   :  { %358 = vsyncadd [#allocation3], 4294965248  ;;  %v391_v0 = vld [vmem:[#allocation2 + $0x40] sm:$0xff]  ;;  %v393_v1 = vld [vmem:[#allocation2 + $0x48] sm:$0xff]  ;;  %v91_v31 = vlaneseq  ;;  %vm96_vm0 = vcmask 130112   ;;  %vm100_vm1 = vcmask 195712  }
   0x7   :  { %v395_v2 = vld [vmem:[#allocation2] sm:$0xff]  ;;  %v59_v3 = vadd.f32 %v393_v1, %v391_v0  ;;  %v399_v4 = vld [vmem:[#allocation2 + $0x8] sm:$0xff]  ;;  %v409_v9 = vld [vmem:[#allocation2 + $0x50] sm:$0xff]  ;;  %vm104_vm2 = vcmask 261312   ;;  %vm113_vm3 = vcmask 1041409   ;;  %vm115_vm4 = vcmask 261120  }
   0x8   :  { %v401_v5 = vld [vmem:[#allocation2 + $0x20] sm:$0xff]  ;;  %v403_v6 = vld [vmem:[#allocation2 + $0x28] sm:$0xff]  ;;  %v47_v7 = vadd.f32 %v399_v4, %v395_v2  ;;  %v411_v10 = vld [vmem:[#allocation2 + $0x58] sm:$0xff]  ;;  %v92_v32 = vand.u32 127, %v91_v31  ;;  %vm144_vm5 = vcmask 1041408   ;;  %vm140_vm6 = vcmask 15360  }
   0x9   :  { %v53_v8 = vadd.f32 %v403_v6, %v401_v5  ;;  %60 = vadd.xlane.f32.xlu1 %v59_v3  ;;  %v413_v11 = vld [vmem:[#allocation2 + $0x10] sm:$0xff]  ;;  %v415_v12 = vld [vmem:[#allocation2 + $0x18] sm:$0xff]  ;;  %v417_v13 = vld [vmem:[#allocation2 + $0x60] sm:$0xff]  ;;  %v62_v15 = vadd.f32 %v411_v10, %v409_v9  ;;  %s275_s30 = sshll.u32 %s479_s3, 4  ;;  %s276_s30 = int_to_ptr.hbm [resolvable:$true] %s275_s30 }
   0xa   :  { %48 = vadd.xlane.f32.xlu0 %v47_v7  ;;  %v419_v14 = vld [vmem:[#allocation2 + $0x68] sm:$0xff]  ;;  %v50_v16 = vadd.f32 %v415_v12, %v413_v11  ;;  %v427_v18 = vld [vmem:[#allocation2 + $0x70] sm:$0xff]  ;;  %v429_v19 = vld [vmem:[#allocation2 + $0x78] sm:$0xff]  ;;  %v94_v34 = vadd.s32 4294967288, %v92_v32  ;;  %v98_v43 = vadd.s32 4294967280, %v92_v32  ;;  %v102_v47 = vadd.s32 4294967272, %v92_v32 }
   0xb   :  { %54 = vadd.xlane.f32.xlu2 %v53_v8  ;;  %v65_v17 = vadd.f32 %v419_v14, %v417_v13  ;;  %v431_v20 = vld [vmem:[#allocation2 + $0x30] sm:$0xff]  ;;  %v433_v21 = vld [vmem:[#allocation2 + $0x38] sm:$0xff]  ;;  %v68_v22 = vadd.f32 %v429_v19, %v427_v18  ;;  %v80_v26 = vld [vmem:[%s477_s1 + $0x8] sm:$0xff] }
   0xc   :  { %v56_v23 = vadd.f32 %v433_v21, %v431_v20  ;;  %v82_v24 = vld [vmem:[%s477_s1 + $0x18] sm:$0xff]  ;;  %v81_v25 = vld [vmem:[%s477_s1 + $0x10] sm:$0xff]  ;;  %v79_v27 = vld [vmem:[%s477_s1] sm:$0xff] }
   0xd   :  { %130 = vmatpush.msra.mxu0 %v82_v24  ;;  %v139_v3 = vld [vmem:[%s478_s2] sm:$0x3]  ;;  %s364_s2 = smov [#allocation5]  }
   0xe   :  { %289 = vmatpush.msk.msra.mxu1 %vm144_vm5, %v139_v3  ;;  %s273_s27 = sshll.u32 %s364_s2, 4  ;;  %s274_s27 = int_to_ptr.vmem [resolvable:$true] %s273_s27 }
   0xf   :  { %131 = vmatpush.msra.mxu0 %v81_v25 }
  0x11   :  { %63 = vadd.xlane.f32.xlu1 %v62_v15  ;;  %132 = vmatpush.msra.mxu0 %v80_v26  ;;  %v189_v15 = vshrl.u32 %v91_v31, 7 }
  0x12   :  { %51 = vadd.xlane.f32.xlu0 %v50_v16 }
  0x13   :  { %66 = vadd.xlane.f32.xlu2 %v65_v17  ;;  %133 = vmatpush.msra.mxu0 %v79_v27  ;;  %v202_v16 = vadd.s32 16, %v189_v15  ;;  %v196_v17 = vadd.s32 8, %v189_v15 }
  0x14   :  { %296 = vset.pattern.permute.xlu2 %v189_v15 }
  0x15   :  { %298 = vset.pattern.permute.xlu1 %v202_v16  ;;  %297 = vset.pattern.permute.xlu0 %v196_v17 }
  0x19   :  { %69 = vadd.xlane.f32.xlu1 %v68_v22 }
  0x1a   :  { %57 = vadd.xlane.f32.xlu0 %v56_v23 }
  0x7c   :  { %v61_v28 = vpop.xlane.xlu1 %60 }
  0x7d   :  { %v49_v29 = vpop.xlane.xlu0 %48  ;;  %v75_v39 = vmul.f32 0.00390625, %v61_v28 }
  0x7e   :  { %v55_v30 = vpop.xlane.xlu2 %54  ;;  %v71_v40 = vmul.f32 0.00390625, %v49_v29 }
  0x7f   :  { %v106_v45 = vperm.slane %v75_v39, %v92_v32  ;;  %v73_v46 = vmul.f32 0.00390625, %v55_v30 }
  0x80   :  { %v93_v48 = vperm.slane %v71_v40, %v92_v32 }
  0x81   :  { %v99_v56 = vperm.slane %v73_v46, %v98_v43 }
  0x84   :  { %v64_v33 = vpop.xlane.xlu1 %63 }
  0x85   :  { %v76_v35 = vmul.f32 0.00390625, %v64_v33  ;;  %v52_v36 = vpop.xlane.xlu0 %51 }
  0x86   :  { %v67_v37 = vpop.xlane.xlu2 %66  ;;  %v72_v38 = vmul.f32 0.00390625, %v52_v36 }
  0x87   :  { %v77_v41 = vmul.f32 0.00390625, %v67_v37  ;;  %v107_v42 = vperm.slane %v76_v35, %v94_v34  ;;  %v208_v37 = vadd.s32 24, %v189_v15 }
  0x88   :  { %v95_v44 = vperm.slane %v72_v38, %v94_v34 }
  0x89   :  { %v109_v49 = vperm.slane %v77_v41, %v98_v43  ;;  %v108_v51 = vsel %vm96_vm0, %v107_v42, %v106_v45 }
  0x8a   :  { %v97_v54 = vsel %vm96_vm0, %v95_v44, %v93_v48 }
  0x8b   :  { %v110_v59 = vsel %vm100_vm1, %v109_v49, %v108_v51  ;;  %v101_v60 = vsel %vm100_vm1, %v99_v56, %v97_v54 }
  0x8c   :  { %v70_v50 = vpop.xlane.xlu1 %69 }
  0x8d   :  { %v78_v52 = vmul.f32 0.00390625, %v70_v50  ;;  %v58_v53 = vpop.xlane.xlu0 %57 }
  0x8e   :  { %v74_v55 = vmul.f32 0.00390625, %v58_v53 }
  0x8f   :  { %v111_v57 = vperm.slane %v78_v52, %v102_v47 }
  0x90   :  { %v103_v58 = vperm.slane %v74_v55, %v102_v47 }
  0x91   :  { %v112_v61 = vsel %vm104_vm2, %v111_v57, %v110_v59 }
  0x92   :  { %v105_v62 = vsel %vm104_vm2, %v103_v58, %v101_v60 }
  0x93   :  { %v114_v63 = vsel %vm113_vm3, %v112_v61, %v105_v62 }
  0x94   :  { %288 = vmatmul.msk.f32.vlgmr.msra.gmra.mxu0 %vm115_vm4, %v114_v63 }
 0x111   :  { %v135_v7 = vpop.f32.mrf.mxu0 }
 0x112   :  { %v138_v8 = vmax.f32 %v135_v7, 0.0 }
 0x114   :  { %290 = vmatmul.msk.f32.vlgmr.msra.gmra.mxu1 %vm140_vm6, %v138_v8 }
 0x191   :  { %v165_v22 = vpop.f32.mrf.mxu1 }
 0x192   :  { %v291_v23 = vmul.f32 -1.442695, %v165_v22 }
 0x194   :  { %305 = vpow2.f32 %v291_v23 }
 0x19a   :  { %v306_v24 = vpop.eup %305 }
 0x19b   :  { %v171_v25 = vadd.f32 1.0, %v306_v24 }
 0x19d   :  { %307 = vrcp.f32 %v171_v25  ;;  %v183_v29 = vand.u32 2147483648, %v171_v25  ;;  %v181_v32 = vand.u32 2147483647, %v171_v25  ;;  %vm177_vm8 = vweird.f32 %v171_v25 }
 0x19f   :  { %v184_v31 = vor.u32 1.1754944e-38, %v183_v29  ;;  %vm182_vm10 = vcmp.eq.f32.partialorder %v181_v32, 8.507059e+37 }
 0x1a3   :  { %v308_v26 = vpop.eup %307 }
 0x1a4   :  { %v173_v27 = vmul.f32 %v308_v26, %v171_v25  ;;  %vm178_vm7 = vweird.f32 %v308_v26 }
 0x1a5   :  { %vm179_vm9 = vmor %vm177_vm8, %vm178_vm7 }
 0x1a6   :  { %v174_v28 = vsub.f32 1.0, %v173_v27 }
 0x1a8   :  { %v175_v30 = vmul.f32 %v308_v26, %v174_v28 }
 0x1aa   :  { %v176_v33 = vadd.f32 %v308_v26, %v175_v30 }
 0x1ac   :  { %v180_v34 = vsel %vm179_vm9, %v308_v26, %v176_v33 }
 0x1ad   :  { %v185_v35 = vsel %vm182_vm10, %v184_v31, %v180_v34 }
 0x1ae   :  { %v187_v36 = vperm.slane %v185_v35, 0  ;;  %v212_v38 = vperm.slane %v185_v35, 1 }
 0x1b0   :  { %204 = vperm.xlu1 %298, %v187_v36   ;;  %198 = vperm.xlu0 %297, %v187_v36  }
 0x1b1   :  { %192 = vperm.xlu2 %296, %v187_v36  }
 0x1b8   :  { %301 = vset.pattern.permute.xlu1 %v196_v17  ;;  %304 = vset.pattern.permute.xlu0 %v208_v37 }
 0x1b9   :  { %299 = vset.pattern.permute.xlu2 %v208_v37 }
 0x1c0   :  { %223 = vperm.xlu1 %301, %v212_v38  }
 0x1c1   :  { %210 = vperm.xlu2 %299, %v187_v36  }
 0x1c8   :  { %303 = vset.pattern.permute.xlu1 %v208_v37 }
 0x1c9   :  { %300 = vset.pattern.permute.xlu2 %v189_v15 }
 0x1d0   :  { %235 = vperm.xlu1 %303, %v212_v38  }
 0x1d1   :  { %217 = vperm.xlu2 %300, %v212_v38  }
 0x1d9   :  { %302 = vset.pattern.permute.xlu2 %v202_v16 }
 0x1e1   :  { %229 = vperm.xlu2 %302, %v212_v38  }
 0x20b   :  { %v193_v39 = vpop.permute.xlu2 %192 }
 0x20c   :  { %v237_v40 = vmul.f32 %v193_v39, %v395_v2  ;;  %v238_v41 = vmul.f32 %v193_v39, %v399_v4 }
 0x20e   :  { %253 = vst [vmem:[#allocation5] sm:$0xff] %v237_v40 }
 0x20f   :  { %254 = vst [vmem:[#allocation5 + $0x8] sm:$0xff] %v238_v41 }
 0x21b   :  { %v211_v42 = vpop.permute.xlu2 %210 }
 0x21c   :  { %v243_v43 = vmul.f32 %v211_v42, %v431_v20  ;;  %v244_v44 = vmul.f32 %v211_v42, %v433_v21 }
 0x21e   :  { %259 = vst [vmem:[#allocation5 + $0x30] sm:$0xff] %v243_v43 }
 0x21f   :  { %260 = vst [vmem:[#allocation5 + $0x38] sm:$0xff] %v244_v44 }
 0x222   :  { %v205_v45 = vpop.permute.xlu1 %204  ;;  %v199_v46 = vpop.permute.xlu0 %198 }
 0x223   :  { %v241_v47 = vmul.f32 %v205_v45, %v401_v5  ;;  %v242_v48 = vmul.f32 %v205_v45, %v403_v6  ;;  %v239_v49 = vmul.f32 %v199_v46, %v413_v11  ;;  %v240_v2 = vmul.f32 %v199_v46, %v415_v12 }
 0x225   :  { %257 = vst [vmem:[#allocation5 + $0x20] sm:$0xff] %v241_v47 }
 0x226   :  { %258 = vst [vmem:[#allocation5 + $0x28] sm:$0xff] %v242_v48 }
 0x227   :  { %255 = vst [vmem:[#allocation5 + $0x10] sm:$0xff] %v239_v49 }
 0x228   :  { %256 = vst [vmem:[#allocation5 + $0x18] sm:$0xff] %v240_v2 }
 0x22b   :  { %v218_v4 = vpop.permute.xlu2 %217 }
 0x22c   :  { %v245_v20 = vmul.f32 %v218_v4, %v391_v0  ;;  %v246_v21 = vmul.f32 %v218_v4, %v393_v1 }
 0x22e   :  { %261 = vst [vmem:[#allocation5 + $0x40] sm:$0xff] %v245_v20 }
 0x22f   :  { %262 = vst [vmem:[#allocation5 + $0x48] sm:$0xff] %v246_v21 }
 0x232   :  { %v224_v50 = vpop.permute.xlu1 %223 }
 0x233   :  { %v247_v5 = vmul.f32 %v224_v50, %v409_v9  ;;  %v248_v6 = vmul.f32 %v224_v50, %v411_v10 }
 0x235   :  { %263 = vst [vmem:[#allocation5 + $0x50] sm:$0xff] %v247_v5 }
 0x236   :  { %264 = vst [vmem:[#allocation5 + $0x58] sm:$0xff] %v248_v6 }
 0x23b   :  { %v230_v11 = vpop.permute.xlu2 %229 }
 0x23c   :  { %v249_v12 = vmul.f32 %v230_v11, %v417_v13  ;;  %v250_v51 = vmul.f32 %v230_v11, %v419_v14 }
 0x23e   :  { %265 = vst [vmem:[#allocation5 + $0x60] sm:$0xff] %v249_v12 }
 0x23f   :  { %266 = vst [vmem:[#allocation5 + $0x68] sm:$0xff] %v250_v51 }
 0x242   :  { %v236_v0 = vpop.permute.xlu1 %235 }
 0x243   :  { %v251_v1 = vmul.f32 %v236_v0, %v427_v18  ;;  %v252_v9 = vmul.f32 %v236_v0, %v429_v19 }
 0x245   :  { %267 = vst [vmem:[#allocation5 + $0x70] sm:$0xff] %v251_v1 }
 0x246   :  { %268 = vst [vmem:[#allocation5 + $0x78] sm:$0xff] %v252_v9 }
 0x247   :  { %281 = dma.vmem_to_hbm [thread:$0]  %s274_s27, 2048, %s276_s30, [#allocation4], %s362_s17, %s362_s17, %s363_s18  }
 0x248   :  { %359 = dma.done.wait [#allocation4], 2048  }
 0x249   :  { %360 = vsyncadd [#allocation4], 4294965248 }
 0x24a   :  { %286 = vsyncpa [#allocation3], 1 }
 0x24b   :  { %287 = vsyncpa [#allocation4], 1 }

</bundles_post_ra>
